<compile_context>
chip_gen: v6e
topology: v6e:2x2x1
jax: 0.10.0
libtpu: 0.0.40
codegen_flags: <defaults>
</compile_context>

<pallas_src>
import jax
import jax.numpy as jnp
from jax.experimental import pallas as pl
from jax.experimental.pallas import tpu as pltpu


def _round_up(n: int, m: int) -> int:
    return ((n + m - 1) // m) * m


def mlp_kernel(x_ref, w1_ref, b1_ref, w2_ref, b2_ref, w3_ref, b3_ref, o_ref):
    x = x_ref[...]                                                    # (TB, 5) bf16

    # Layer 1: (TB,5) @ (5,32) on the MXU, f32 accumulate, f32 bias + ReLU.
    h1 = jnp.dot(x, w1_ref[...], preferred_element_type=jnp.float32)
    h1 = jnp.maximum(h1 + b1_ref[...], 0.0)                           # (TB, 32) f32

    # Layer 2: feed MXU in bf16, accumulate f32.
    h2 = jnp.dot(h1.astype(w2_ref.dtype), w2_ref[...],
                 preferred_element_type=jnp.float32)
    h2 = jnp.maximum(h2 + b2_ref[...], 0.0)                           # (TB, 16) f32

    # Layer 3 (out_features=1): VPU multiply + lane reduce instead of an
    # N=1 MXU pass. w3_ref is the (1, 16) row vector (W3^T).
    z = jnp.sum(h2 * w3_ref[...], axis=-1, keepdims=True) + b3_ref[...]  # (TB, 1)

    o_ref[...] = jax.nn.sigmoid(z).astype(o_ref.dtype)


def arithmetic_classifier(x, params, *, block_b: int = 1024):
    """x: (B, 5) float32 -> (B, 1) float32."""
    w1, b1, w2, b2, w3, b3 = params
    B, F = x.shape
    assert F == 5

    # Batch tile: multiple of 8 (sublane), capped for VMEM; pad B up to it.
    TB = min(block_b, _round_up(B, 8))
    Bpad = _round_up(B, TB)
    if Bpad != B:
        x = jnp.pad(x, ((0, Bpad - B), (0, 0)))
    nb = Bpad // TB

    # bf16 for the streamed activations and the two MXU weight matrices;
    # biases and the tiny last-layer row stay f32.
    x_bf = x.astype(jnp.bfloat16)
    w1_bf = w1.astype(jnp.bfloat16)
    w2_bf = w2.astype(jnp.bfloat16)
    w3_row = w3.T  # (1, 16) f32

    const = lambda shape: pl.BlockSpec(shape, lambda i: (0, 0))

    out = pl.pallas_call(
        mlp_kernel,
        out_shape=jax.ShapeDtypeStruct((Bpad, 1), jnp.float32),
        grid=(nb,),
        in_specs=[
            pl.BlockSpec((TB, 5), lambda i: (i, 0)),     # streamed batch tiles
            const(w1_bf.shape), const(b1.shape),          # resident weights
            const(w2_bf.shape), const(b2.shape),
            const(w3_row.shape), const(b3.shape),
        ],
        out_specs=pl.BlockSpec((TB, 1), lambda i: (i, 0)),
        compiler_params=pltpu.CompilerParams(
            dimension_semantics=("parallel",)),
    )(x_bf, w1_bf, b1, w2_bf, b2, w3_row, b3)

    return out[:B]


def init_params(key):
    """Deterministic init matching nn.Linear shapes (stored transposed)."""
    def linear(key, fan_in, fan_out):
        kw, kb = jax.random.split(key)
        bound = 1.0 / jnp.sqrt(fan_in)
        w = jax.random.uniform(kw, (fan_in, fan_out), jnp.float32, -bound, bound)
        b = jax.random.uniform(kb, (1, fan_out), jnp.float32, -bound, bound)
        return w, b

    k1, k2, k3 = jax.random.split(key, 3)
    w1, b1 = linear(k1, 5, 32)
    w2, b2 = linear(k2, 32, 16)
    w3, b3 = linear(k3, 16, 1)
    return w1, b1, w2, b2, w3, b3


def reference(x, params):
    w1, b1, w2, b2, w3, b3 = params
    h1 = jnp.maximum(x @ w1 + b1, 0.0)
    h2 = jnp.maximum(h1 @ w2 + b2, 0.0)
    return jax.nn.sigmoid(h2 @ w3 + b3)


if __name__ == "__main__":
    key = jax.random.PRNGKey(0)
    kx, kx2, kp = jax.random.split(key, 3)
    params = init_params(kp)

    # Small primary test (single tile, TB == B == 8).
    B = 8
    x = jax.random.normal(kx, (B, 5), jnp.float32)
    out = arithmetic_classifier(x, params)
    jax.block_until_ready(out)
    ref = reference(x, params)
    assert out.shape == (B, 1)
    # bf16 inputs vs f32 reference -> loose tolerance on the [0,1] output.
    assert jnp.allclose(out, ref, atol=2e-2, rtol=0.0), float(
        jnp.max(jnp.abs(out - ref)))

    # Secondary test: ragged batch exercising multi-tile grid + padding.
    B2 = 1031  # pads to 2048 with TB=1024 -> grid=(2,)
    x2 = jax.random.normal(kx2, (B2, 5), jnp.float32)
    out2 = arithmetic_classifier(x2, params)
    jax.block_until_ready(out2)
    ref2 = reference(x2, params)
    assert out2.shape == (B2, 1)
    assert jnp.allclose(out2, ref2, atol=2e-2, rtol=0.0), float(
        jnp.max(jnp.abs(out2 - ref2)))

    print("KERNEL_OK")
</pallas_src>

<mosaic_0001>
module attributes {stable_mosaic.version = 11 : i64} {
  func.func @mlp_kernel(%arg0: i32, %arg1: memref<8x5xbf16, #tpu.memory_space<vmem>>, %arg2: memref<5x32xbf16, #tpu.memory_space<vmem>>, %arg3: memref<1x32xf32, #tpu.memory_space<vmem>>, %arg4: memref<32x16xbf16, #tpu.memory_space<vmem>>, %arg5: memref<1x16xf32, #tpu.memory_space<vmem>>, %arg6: memref<1x16xf32, #tpu.memory_space<vmem>>, %arg7: memref<1x1xf32, #tpu.memory_space<vmem>>, %arg8: memref<8x1xf32, #tpu.memory_space<vmem>>) attributes {dimension_semantics = [#tpu.dimension_semantics<parallel>], iteration_bounds = array<i64: 1>, scalar_prefetch = 0 : i64, scratch_operands = 0 : i64, tpu.core_type = #tpu.core_type<tc>, window_params = [{transform_indices = @transform_0, window_bounds = array<i64: 8, 5>}, {pipeline_mode = #tpu.pipeline_mode<synchronous>, transform_indices = @transform_1, window_bounds = array<i64: 5, 32>}, {pipeline_mode = #tpu.pipeline_mode<synchronous>, transform_indices = @transform_2, window_bounds = array<i64: 1, 32>}, {pipeline_mode = #tpu.pipeline_mode<synchronous>, transform_indices = @transform_3, window_bounds = array<i64: 32, 16>}, {pipeline_mode = #tpu.pipeline_mode<synchronous>, transform_indices = @transform_4, window_bounds = array<i64: 1, 16>}, {pipeline_mode = #tpu.pipeline_mode<synchronous>, transform_indices = @transform_5, window_bounds = array<i64: 1, 16>}, {pipeline_mode = #tpu.pipeline_mode<synchronous>, transform_indices = @transform_6, window_bounds = array<i64: 1, 1>}, {transform_indices = @transform_7, window_bounds = array<i64: 8, 1>}]} {
    %c0 = arith.constant 0 : index
    %c0_0 = arith.constant 0 : index
    %0 = vector.load %arg1[%c0, %c0_0] : memref<8x5xbf16, #tpu.memory_space<vmem>>, vector<8x5xbf16>
    %c0_1 = arith.constant 0 : index
    %c0_2 = arith.constant 0 : index
    %1 = vector.load %arg2[%c0_1, %c0_2] : memref<5x32xbf16, #tpu.memory_space<vmem>>, vector<5x32xbf16>
    %cst = arith.constant dense<0.000000e+00> : vector<8x32xf32>
    %2 = tpu.matmul %0, %1, %cst {dimension_numbers = #tpu.dot_dimension_numbers<[1], [0], [0], [1], [0, 0, 1, 1], [], []>} : vector<8x5xbf16>, vector<5x32xbf16>, vector<8x32xf32> -> vector<8x32xf32>
    %c0_3 = arith.constant 0 : index
    %c0_4 = arith.constant 0 : index
    %3 = vector.load %arg3[%c0_3, %c0_4] : memref<1x32xf32, #tpu.memory_space<vmem>>, vector<1x32xf32>
    %4 = vector.broadcast %3 : vector<1x32xf32> to vector<8x32xf32>
    %5 = arith.addf %2, %4 : vector<8x32xf32>
    %cst_5 = arith.constant 0.000000e+00 : f32
    %6 = vector.broadcast %cst_5 : f32 to vector<8x32xf32>
    %7 = arith.maximumf %5, %6 : vector<8x32xf32>
    %8 = arith.truncf %7 : vector<8x32xf32> to vector<8x32xbf16>
    %c0_6 = arith.constant 0 : index
    %c0_7 = arith.constant 0 : index
    %9 = vector.load %arg4[%c0_6, %c0_7] : memref<32x16xbf16, #tpu.memory_space<vmem>>, vector<32x16xbf16>
    %cst_8 = arith.constant dense<0.000000e+00> : vector<8x16xf32>
    %10 = tpu.matmul %8, %9, %cst_8 {dimension_numbers = #tpu.dot_dimension_numbers<[1], [0], [0], [1], [0, 0, 1, 1], [], []>} : vector<8x32xbf16>, vector<32x16xbf16>, vector<8x16xf32> -> vector<8x16xf32>
    %c0_9 = arith.constant 0 : index
    %c0_10 = arith.constant 0 : index
    %11 = vector.load %arg5[%c0_9, %c0_10] : memref<1x16xf32, #tpu.memory_space<vmem>>, vector<1x16xf32>
    %12 = vector.broadcast %11 : vector<1x16xf32> to vector<8x16xf32>
    %13 = arith.addf %10, %12 : vector<8x16xf32>
    %cst_11 = arith.constant 0.000000e+00 : f32
    %14 = vector.broadcast %cst_11 : f32 to vector<8x16xf32>
    %15 = arith.maximumf %13, %14 : vector<8x16xf32>
    %c0_12 = arith.constant 0 : index
    %c0_13 = arith.constant 0 : index
    %16 = vector.load %arg6[%c0_12, %c0_13] : memref<1x16xf32, #tpu.memory_space<vmem>>, vector<1x16xf32>
    %17 = vector.broadcast %16 : vector<1x16xf32> to vector<8x16xf32>
    %18 = arith.mulf %15, %17 : vector<8x16xf32>
    %cst_14 = arith.constant dense<0.000000e+00> : vector<8xf32>
    %19 = vector.multi_reduction <add>, %18, %cst_14 [1] : vector<8x16xf32> to vector<8xf32>
    %20 = vector.shape_cast %19 : vector<8xf32> to vector<8x1xf32>
    %c0_15 = arith.constant 0 : index
    %c0_16 = arith.constant 0 : index
    %21 = vector.load %arg7[%c0_15, %c0_16] : memref<1x1xf32, #tpu.memory_space<vmem>>, vector<1x1xf32>
    %22 = vector.broadcast %21 : vector<1x1xf32> to vector<8x1xf32>
    %23 = arith.addf %20, %22 : vector<8x1xf32>
    %24 = arith.negf %23 : vector<8x1xf32>
    %25 = math.exp %24 : vector<8x1xf32>
    %cst_17 = arith.constant 1.000000e+00 : f32
    %26 = vector.broadcast %cst_17 : f32 to vector<8x1xf32>
    %27 = arith.addf %26, %25 : vector<8x1xf32>
    %28 = arith.divf %26, %27 : vector<8x1xf32>
    %c0_18 = arith.constant 0 : index
    %c0_19 = arith.constant 0 : index
    %29 = vector.load %arg8[%c0_18, %c0_19] : memref<8x1xf32, #tpu.memory_space<vmem>>, vector<8x1xf32>
    tpu.vector_store %arg8[%c0_18, %c0_19], %28 {strides = array<i32>} : memref<8x1xf32, #tpu.memory_space<vmem>>, vector<8x1xf32>,
    return
  }
  func.func @transform_0(%arg0: i32) -> (i32, i32) {
    %c0_i32 = arith.constant 0 : i32
    %c0_i32_0 = arith.constant 0 : i32
    return %arg0, %c0_i32 : i32, i32
  }
  func.func @transform_1(%arg0: i32) -> (i32, i32) {
    %c0_i32 = arith.constant 0 : i32
    %c0_i32_0 = arith.constant 0 : i32
    %c0_i32_1 = arith.constant 0 : i32
    return %c0_i32, %c0_i32_0 : i32, i32
  }
  func.func @transform_2(%arg0: i32) -> (i32, i32) {
    %c0_i32 = arith.constant 0 : i32
    %c0_i32_0 = arith.constant 0 : i32
    %c0_i32_1 = arith.constant 0 : i32
    return %c0_i32, %c0_i32_0 : i32, i32
  }
  func.func @transform_3(%arg0: i32) -> (i32, i32) {
    %c0_i32 = arith.constant 0 : i32
    %c0_i32_0 = arith.constant 0 : i32
    %c0_i32_1 = arith.constant 0 : i32
    return %c0_i32, %c0_i32_0 : i32, i32
  }
  func.func @transform_4(%arg0: i32) -> (i32, i32) {
    %c0_i32 = arith.constant 0 : i32
    %c0_i32_0 = arith.constant 0 : i32
    %c0_i32_1 = arith.constant 0 : i32
    return %c0_i32, %c0_i32_0 : i32, i32
  }
  func.func @transform_5(%arg0: i32) -> (i32, i32) {
    %c0_i32 = arith.constant 0 : i32
    %c0_i32_0 = arith.constant 0 : i32
    %c0_i32_1 = arith.constant 0 : i32
    return %c0_i32, %c0_i32_0 : i32, i32
  }
  func.func @transform_6(%arg0: i32) -> (i32, i32) {
    %c0_i32 = arith.constant 0 : i32
    %c0_i32_0 = arith.constant 0 : i32
    %c0_i32_1 = arith.constant 0 : i32
    return %c0_i32, %c0_i32_0 : i32, i32
  }
  func.func @transform_7(%arg0: i32) -> (i32, i32) {
    %c0_i32 = arith.constant 0 : i32
    %c0_i32_0 = arith.constant 0 : i32
    return %arg0, %c0_i32 : i32, i32
  }
}

</mosaic_0001>

<bundles_post_ra>
// kernel: tpu_custom_call.1
= control target key start
LH: loop header
LB: loop body
LE: loop exit
PB: predicated region body
PF: predicated region fallthrough
CT: control target
= control target key end

     0   :  { %vm42_vm0 = vcmask 1041408   ;;  %vm43_vm1 = vcmask 1042432   ;;  %v228_v0 = vmov 0.0   ;;  %v229_v2 = vmov 65535   ;;  %s298_s1 = inlined_call_operand.vmem [shape: bf16[5,32], index: 1, kind: input, shape index: {}]   ;;  %s299_s0 = inlined_call_operand.vmem [shape: bf16[8,5], index: 0, kind: input, shape index: {}]   ;;  %s300_s3 = inlined_call_operand.vmem [shape: bf16[32,16], index: 3, kind: input, shape index: {}]   ;;  %s301_s2 = inlined_call_operand.vmem [shape: f32[1,32], index: 2, kind: input, shape index: {}]   ;;  %s302_s6 = inlined_call_operand.<no memory space> [shape: f32[1,1], index: 6, kind: input, shape index: {}]   ;;  %s303_s4 = inlined_call_operand.vmem [shape: f32[1,16], index: 4, kind: input, shape index: {}]   ;;  %s304_s5 = inlined_call_operand.vmem [shape: f32[1,16], index: 5, kind: input, shape index: {}]   ;;  %s305_s7 = inlined_call_operand.vmem [shape: f32[8,1], index: 7, kind: output, shape index: {}]  }
   0x1   :  { %205 = vmatprep.subr.bf16.mxu0 %v228_v0  ;;  %v30_v1 = vld [vmem:[%s298_s1] sm:$0x7]  ;;  %v44_v3 = vsel %vm42_vm0, 4294967295, %v229_v2  ;;  %211 = vmatprep.subr.bf16.mxu1 %v228_v0  ;;  %vm230_vm2 = vmmov 0   ;;  %vm38_vm3 = vcmask 39936   ;;  %v222_v7 = vld [vmem:[%s300_s3 + $0x8] sm:$0xff]   ;;  %v12_v17 = vstv %s302_s6 }
   0x2   :  { %v45_v4 = vsel %vm43_vm1, %v44_v3, 0  ;;  %207 = vmatprep.mubr.msk.bf16.mxu0 %vm230_vm2, %v228_v0  ;;  %215 = vmatprep.mubr.msk.bf16.mxu1 %vm230_vm2, %v228_v0  ;;  %v29_v6 = vld [vmem:[%s299_s0] sm:$0xf]  ;;  %vm114_vm4 = vcmask 261120   ;;  %13 = vst [vmem:[#allocation2] sm:$0x1] %v12_v17 }
   0x3   :  { %v47_v5 = vand.u32 %v45_v4, %v30_v1  ;;  %212 = vmatpush3.bf16.msra.mxu1 %v222_v7  ;;  %v223_v8 = vld [vmem:[%s300_s3] sm:$0xff]   ;;  %vm167_vm5 = vcmask 130048   ;;  %vm185_vm6 = vcmask 7168  }
   0x4   :  { %213 = vmatprep.subr.bf16.mxu1 %v228_v0  ;;  %v191_v9 = vld [vmem:[%s301_s2] ss:$0 sm:$0xff] }
   0x5   :  { %206 = vmatpush3.bf16.msra.mxu0 %v47_v5  ;;  %v193_v18 = vld [vmem:[%s303_s4] ss:$0 sm:$0xff] }
   0x6   :  { %v197_v22 = vld [vmem:[%s304_s5] ss:$0 sm:$0xff] }
   0x7   :  { %214 = vmatpush3.bf16.msra.mxu1 %v223_v8 }
   0x8   :  { %208 = vmatmul.mubr.msk.bf16.vlgmr.msra.gmra.mxu0 %vm38_vm3, %v29_v6 }
   0x9   :  { %v198_v28 = vld [vmem:[#allocation2] ss:$0 sm:$0xff] }
  0xc8   :  { %v83_v10 = vpop.f32.mrf.mxu0 }
  0xc9   :  { %v84_v11 = vadd.f32 %v191_v9, %v83_v10 }
  0xca   :  { %v209_v12 = vpop.f32.mrf.mxu0 }
  0xcb   :  { %v89_v13 = vmax.f32 %v84_v11, 0.0 }
  0xcc   :  { %v86_v14 = vpop.f32.mrf.mxu0 }
  0xcd   :  { %v90_v15 = vpack.c.bf16 %v89_v13, %v89_v13 }
  0xce   :  { %v210_v16 = vpop.f32.mrf.mxu0 }
  0xcf   :  { %216 = vmatmul.mubr.msk.bf16.vlgmr.msra.gmra.mxu1 %vm114_vm4, %v90_v15 }
 0x18f   :  { %v152_v19 = vpop.f32.mrf.mxu1 }
 0x190   :  { %v153_v20 = vadd.f32 %v193_v18, %v152_v19 }
 0x191   :  { %v217_v21 = vpop.f32.mrf.mxu1 }
 0x192   :  { %v158_v23 = vmax.f32 %v153_v20, 0.0 }
 0x193   :  { %v155_v24 = vpop.f32.mrf.mxu1 }
 0x194   :  { %v166_v25 = vmul.f32 %v197_v22, %v158_v23 }
 0x195   :  { %v218_v26 = vpop.f32.mrf.mxu1 }
 0x196   :  { %v168_v27 = vsel %vm167_vm5, %v166_v25, 0.0 }
 0x197   :  { %169 = vadd.xlane.f32.xlu0 %v168_v27 }
 0x220   :  { %v170_v29 = vpop.xlane.xlu0 %169 }
 0x221   :  { %v178_v30 = vadd.f32 %v198_v28, %v170_v29 }
 0x223   :  { %v199_v31 = vmul.f32 -1.442695, %v178_v30 }
 0x225   :  { %224 = vpow2.f32 %v199_v31 }
 0x232   :  { %v225_v32 = vpop.eup %224 }
 0x233   :  { %v182_v33 = vadd.f32 1.0, %v225_v32 }
 0x235   :  { %226 = vrcp.f32 %v182_v33 }
 0x242   :  { %v227_v34 = vpop.eup %226 }
 0x243   :  { %186 = vst.msk [vmem:[%s305_s7] sm:$0xff] %vm185_vm6, %v227_v34 }

</bundles_post_ra>
